<compile_context>
chip_gen: v6e
topology: v6e:2x2x1
jax: 0.10.0
libtpu: 0.0.40
codegen_flags: <defaults>
</compile_context>

<pallas_src>
import jax
import jax.numpy as jnp
from jax.experimental import pallas as pl
from jax.experimental.pallas import tpu as pltpu


EMB = 128
HIDDEN = 256
OUT = 128


def _fd_kernel(x_ref, oh_ref,
               w1_ref, w1a_ref,
               w2m_ref, b2m_ref, w2s_ref, b2s_ref,
               out_mean_ref, out_std_ref):
    """Fused two-branch MLP.

    x_ref:   (TM, 128)            state rows (streamed)
    oh_ref:  (TM, A_pad)          one-hot action rows (streamed)
    w1_ref:  (128, 512)           [W1_mean | W1_std] state part (resident)
    w1a_ref: (A_pad, 512)         action part with b1 folded in (resident)
    w2*_ref: (256, 128), b2*_ref: (1, 128)
    out_*:   (TM, 128)
    """
    # Fused first layer of both branches: one N=512 MXU matmul (K=128, no padding),
    # plus a tiny action-gather matmul that also carries the layer-1 bias.
    h = jnp.dot(x_ref[...], w1_ref[...], preferred_element_type=jnp.float32)
    h = h + jnp.dot(oh_ref[...], w1a_ref[...], preferred_element_type=jnp.float32)
    h = jnp.maximum(h, 0.0)  # ReLU in f32 (VPU; v5e has no bf16 VPU path)

    h_m = h[:, :HIDDEN].astype(w2m_ref.dtype)   # lane-256 boundary, tile aligned
    h_s = h[:, HIDDEN:].astype(w2s_ref.dtype)

    out_mean_ref[...] = (
        jnp.dot(h_m, w2m_ref[...], preferred_element_type=jnp.float32) + b2m_ref[...]
    ).astype(out_mean_ref.dtype)
    out_std_ref[...] = (
        jnp.dot(h_s, w2s_ref[...], preferred_element_type=jnp.float32) + b2s_ref[...]
    ).astype(out_std_ref.dtype)


def _round_up(x, m):
    return ((x + m - 1) // m) * m


def init_params(num_actions, key):
    """PyTorch-Linear-style init (uniform +/- 1/sqrt(fan_in)).

    Weights stored as (in_features, out_features)."""
    in_dim = EMB + num_actions
    keys = jax.random.split(key, 8)

    def lin(kw, kb, fan_in, fan_out):
        bound = 1.0 / jnp.sqrt(jnp.float32(fan_in))
        w = jax.random.uniform(kw, (fan_in, fan_out), jnp.float32, -bound, bound)
        b = jax.random.uniform(kb, (1, fan_out), jnp.float32, -bound, bound)
        return w, b

    w1m, b1m = lin(keys[0], keys[1], in_dim, HIDDEN)
    w2m, b2m = lin(keys[2], keys[3], HIDDEN, OUT)
    w1s, b1s = lin(keys[4], keys[5], in_dim, HIDDEN)
    w2s, b2s = lin(keys[6], keys[7], HIDDEN, OUT)
    return dict(w1m=w1m, b1m=b1m, w2m=w2m, b2m=b2m,
                w1s=w1s, b1s=b1s, w2s=w2s, b2s=b2s)


def forward_dynamic_uncertainty_net(state_embedding, action, params, num_actions,
                                    *, block_rows=1024, matmul_dtype=jnp.float32):
    """state_embedding: (T, B, 128) float32, action: (T, B) int32.

    Returns (next_state_emb_mean, next_state_emb_std), each (T, B, 128) float32."""
    T, B, E = state_embedding.shape
    assert E == EMB
    M = T * B

    # Row-tile size: large for pipelining/roofline, clamped (8-aligned) when M is small.
    tm = block_rows if M >= block_rows else max(8, _round_up(M, 8))
    m_pad = _round_up(M, tm)

    x = state_embedding.reshape(M, EMB)
    act = action.reshape(M)
    if m_pad != M:
        x = jnp.pad(x, ((0, m_pad - M), (0, 0)))
        act = jnp.pad(act, (0, m_pad - M))  # pads with action 0 (a valid index)

    # Pad the one-hot width to a multiple of 8 (sublane alignment); extra cols are 0.
    a_pad = _round_up(max(num_actions, 1), 8)
    one_hot = jax.nn.one_hot(act, a_pad, dtype=jnp.float32)  # (m_pad, a_pad)

    # Fuse both branches' first layers along the output dim:
    #   W1  = [W1m_state | W1s_state]            : (128, 512)
    #   W1a = [W1m_act + b1m | W1s_act + b1s]    : (A, 512), zero-padded to (a_pad, 512)
    # Folding b1 into W1a is exact because every one-hot row sums to exactly 1.
    w1 = jnp.concatenate([params["w1m"][:EMB], params["w1s"][:EMB]], axis=1)
    w1a = jnp.concatenate(
        [params["w1m"][EMB:] + params["b1m"], params["w1s"][EMB:] + params["b1s"]],
        axis=1)
    w1a = jnp.pad(w1a, ((0, a_pad - num_actions), (0, 0)))

    # Optional low-precision MXU inputs (f32 accumulation kept in-kernel).
    x = x.astype(matmul_dtype)
    one_hot = one_hot.astype(matmul_dtype)
    w1 = w1.astype(matmul_dtype)
    w1a = w1a.astype(matmul_dtype)
    w2m = params["w2m"].astype(matmul_dtype)
    w2s = params["w2s"].astype(matmul_dtype)

    grid = (m_pad // tm,)

    def row_spec(cols):
        return pl.BlockSpec((tm, cols), lambda i: (i, 0))

    def resident_spec(shape):
        # Constant index_map: block never changes -> stays VMEM-resident, no re-DMA.
        return pl.BlockSpec(shape, lambda i: (0, 0))

    out_mean, out_std = pl.pallas_call(
        _fd_kernel,
        out_shape=(jax.ShapeDtypeStruct((m_pad, OUT), jnp.float32),
                   jax.ShapeDtypeStruct((m_pad, OUT), jnp.float32)),
        grid=grid,
        in_specs=[
            row_spec(EMB),                       # x (streamed)
            row_spec(a_pad),                     # one-hot (streamed)
            resident_spec((EMB, 2 * HIDDEN)),    # fused W1
            resident_spec((a_pad, 2 * HIDDEN)),  # fused action W1 (+b1 folded)
            resident_spec((HIDDEN, OUT)), resident_spec((1, OUT)),   # W2m, b2m
            resident_spec((HIDDEN, OUT)), resident_spec((1, OUT)),   # W2s, b2s
        ],
        out_specs=(row_spec(OUT), row_spec(OUT)),
        compiler_params=pltpu.CompilerParams(
            dimension_semantics=("parallel",),        # megacore split on v7x
            vmem_limit_bytes=32 * 1024 * 1024),       # safe on v5e/v6e/v7x, >> working set
    )(x, one_hot, w1, w1a, w2m, params["b2m"], w2s, params["b2s"])

    return out_mean[:M].reshape(T, B, OUT), out_std[:M].reshape(T, B, OUT)


def _reference(state_embedding, action, params, num_actions):
    """Pure-JAX reference matching the PyTorch module semantics."""
    action_one_hot = jax.nn.one_hot(action, num_actions, dtype=jnp.float32)
    x = jnp.concatenate([state_embedding, action_one_hot], axis=2)
    h_m = jnp.maximum(x @ params["w1m"] + params["b1m"][0], 0.0)
    o_m = h_m @ params["w2m"] + params["b2m"][0]
    h_s = jnp.maximum(x @ params["w1s"] + params["b1s"][0], 0.0)
    o_s = h_s @ params["w2s"] + params["b2s"][0]
    return o_m, o_s


if __name__ == "__main__":
    key = jax.random.PRNGKey(0)

    def run_case(T, B, num_actions, k):
        k_emb, k_act, k_par = jax.random.split(k, 3)
        se = jax.random.normal(k_emb, (T, B, EMB), dtype=jnp.float32)
        ac = jax.random.randint(k_act, (T, B), 0, num_actions, dtype=jnp.int32)
        params = init_params(num_actions, k_par)

        mean, std = forward_dynamic_uncertainty_net(se, ac, params, num_actions)
        mean, std = jax.block_until_ready(mean), jax.block_until_ready(std)

        ref_mean, ref_std = _reference(se, ac, params, num_actions)
        assert mean.shape == (T, B, OUT) and std.shape == (T, B, OUT)
        assert jnp.allclose(mean, ref_mean, atol=5e-4, rtol=5e-4), \
            float(jnp.abs(mean - ref_mean).max())
        assert jnp.allclose(std, ref_std, atol=5e-4, rtol=5e-4), \
            float(jnp.abs(std - ref_std).max())

    k1, k2 = jax.random.split(key)
    run_case(8, 2, 4, k1)     # small: M=16, single tile
    run_case(33, 40, 6, k2)   # larger: M=1320 -> padded 2048, grid=(2,), pipelined

    print("KERNEL_OK")
</pallas_src>

<mosaic_0001>
module attributes {stable_mosaic.version = 11 : i64} {
  func.func @_fd_kernel(%arg0: i32, %arg1: memref<16x128xf32, #tpu.memory_space<vmem>>, %arg2: memref<16x8xf32, #tpu.memory_space<vmem>>, %arg3: memref<128x512xf32, #tpu.memory_space<vmem>>, %arg4: memref<8x512xf32, #tpu.memory_space<vmem>>, %arg5: memref<256x128xf32, #tpu.memory_space<vmem>>, %arg6: memref<1x128xf32, #tpu.memory_space<vmem>>, %arg7: memref<256x128xf32, #tpu.memory_space<vmem>>, %arg8: memref<1x128xf32, #tpu.memory_space<vmem>>, %arg9: memref<16x128xf32, #tpu.memory_space<vmem>>, %arg10: memref<16x128xf32, #tpu.memory_space<vmem>>) attributes {dimension_semantics = [#tpu.dimension_semantics<parallel>], iteration_bounds = array<i64: 1>, scalar_prefetch = 0 : i64, scratch_operands = 0 : i64, tpu.core_type = #tpu.core_type<tc>, window_params = [{transform_indices = @transform_0, window_bounds = array<i64: 16, 128>}, {transform_indices = @transform_1, window_bounds = array<i64: 16, 8>}, {pipeline_mode = #tpu.pipeline_mode<synchronous>, transform_indices = @transform_2, window_bounds = array<i64: 128, 512>}, {pipeline_mode = #tpu.pipeline_mode<synchronous>, transform_indices = @transform_3, window_bounds = array<i64: 8, 512>}, {pipeline_mode = #tpu.pipeline_mode<synchronous>, transform_indices = @transform_4, window_bounds = array<i64: 256, 128>}, {pipeline_mode = #tpu.pipeline_mode<synchronous>, transform_indices = @transform_5, window_bounds = array<i64: 1, 128>}, {pipeline_mode = #tpu.pipeline_mode<synchronous>, transform_indices = @transform_6, window_bounds = array<i64: 256, 128>}, {pipeline_mode = #tpu.pipeline_mode<synchronous>, transform_indices = @transform_7, window_bounds = array<i64: 1, 128>}, {transform_indices = @transform_8, window_bounds = array<i64: 16, 128>}, {transform_indices = @transform_9, window_bounds = array<i64: 16, 128>}]} {
    %c0 = arith.constant 0 : index
    %c0_0 = arith.constant 0 : index
    %0 = vector.load %arg1[%c0, %c0_0] : memref<16x128xf32, #tpu.memory_space<vmem>>, vector<16x128xf32>
    %c0_1 = arith.constant 0 : index
    %c0_2 = arith.constant 0 : index
    %1 = vector.load %arg3[%c0_1, %c0_2] : memref<128x512xf32, #tpu.memory_space<vmem>>, vector<128x512xf32>
    %cst = arith.constant dense<0.000000e+00> : vector<16x512xf32>
    %2 = tpu.matmul %0, %1, %cst {dimension_numbers = #tpu.dot_dimension_numbers<[1], [0], [0], [1], [0, 0, 1, 1], [], []>} : vector<16x128xf32>, vector<128x512xf32>, vector<16x512xf32> -> vector<16x512xf32>
    %c0_3 = arith.constant 0 : index
    %c0_4 = arith.constant 0 : index
    %3 = vector.load %arg2[%c0_3, %c0_4] : memref<16x8xf32, #tpu.memory_space<vmem>>, vector<16x8xf32>
    %c0_5 = arith.constant 0 : index
    %c0_6 = arith.constant 0 : index
    %4 = vector.load %arg4[%c0_5, %c0_6] : memref<8x512xf32, #tpu.memory_space<vmem>>, vector<8x512xf32>
    %cst_7 = arith.constant dense<0.000000e+00> : vector<16x512xf32>
    %5 = tpu.matmul %3, %4, %cst_7 {dimension_numbers = #tpu.dot_dimension_numbers<[1], [0], [0], [1], [0, 0, 1, 1], [], []>} : vector<16x8xf32>, vector<8x512xf32>, vector<16x512xf32> -> vector<16x512xf32>
    %6 = arith.addf %2, %5 : vector<16x512xf32>
    %cst_8 = arith.constant 0.000000e+00 : f32
    %7 = vector.broadcast %cst_8 : f32 to vector<16x512xf32>
    %8 = arith.maximumf %6, %7 : vector<16x512xf32>
    %9 = vector.extract_strided_slice %8 {offsets = [0, 0], sizes = [16, 256], strides = [1, 1]} : vector<16x512xf32> to vector<16x256xf32>
    %10 = vector.extract_strided_slice %8 {offsets = [0, 256], sizes = [16, 256], strides = [1, 1]} : vector<16x512xf32> to vector<16x256xf32>
    %c0_9 = arith.constant 0 : index
    %c0_10 = arith.constant 0 : index
    %11 = vector.load %arg5[%c0_9, %c0_10] : memref<256x128xf32, #tpu.memory_space<vmem>>, vector<256x128xf32>
    %cst_11 = arith.constant dense<0.000000e+00> : vector<16x128xf32>
    %12 = tpu.matmul %9, %11, %cst_11 {dimension_numbers = #tpu.dot_dimension_numbers<[1], [0], [0], [1], [0, 0, 1, 1], [], []>} : vector<16x256xf32>, vector<256x128xf32>, vector<16x128xf32> -> vector<16x128xf32>
    %c0_12 = arith.constant 0 : index
    %c0_13 = arith.constant 0 : index
    %13 = vector.load %arg6[%c0_12, %c0_13] : memref<1x128xf32, #tpu.memory_space<vmem>>, vector<1x128xf32>
    %14 = vector.broadcast %13 : vector<1x128xf32> to vector<16x128xf32>
    %15 = arith.addf %12, %14 : vector<16x128xf32>
    %c0_14 = arith.constant 0 : index
    %c0_15 = arith.constant 0 : index
    %16 = vector.load %arg9[%c0_14, %c0_15] : memref<16x128xf32, #tpu.memory_space<vmem>>, vector<16x128xf32>
    tpu.vector_store %arg9[%c0_14, %c0_15], %15 {strides = array<i32>} : memref<16x128xf32, #tpu.memory_space<vmem>>, vector<16x128xf32>,
    %c0_16 = arith.constant 0 : index
    %c0_17 = arith.constant 0 : index
    %17 = vector.load %arg7[%c0_16, %c0_17] : memref<256x128xf32, #tpu.memory_space<vmem>>, vector<256x128xf32>
    %cst_18 = arith.constant dense<0.000000e+00> : vector<16x128xf32>
    %18 = tpu.matmul %10, %17, %cst_18 {dimension_numbers = #tpu.dot_dimension_numbers<[1], [0], [0], [1], [0, 0, 1, 1], [], []>} : vector<16x256xf32>, vector<256x128xf32>, vector<16x128xf32> -> vector<16x128xf32>
    %c0_19 = arith.constant 0 : index
    %c0_20 = arith.constant 0 : index
    %19 = vector.load %arg8[%c0_19, %c0_20] : memref<1x128xf32, #tpu.memory_space<vmem>>, vector<1x128xf32>
    %20 = vector.broadcast %19 : vector<1x128xf32> to vector<16x128xf32>
    %21 = arith.addf %18, %20 : vector<16x128xf32>
    %c0_21 = arith.constant 0 : index
    %c0_22 = arith.constant 0 : index
    %22 = vector.load %arg10[%c0_21, %c0_22] : memref<16x128xf32, #tpu.memory_space<vmem>>, vector<16x128xf32>
    tpu.vector_store %arg10[%c0_21, %c0_22], %21 {strides = array<i32>} : memref<16x128xf32, #tpu.memory_space<vmem>>, vector<16x128xf32>,
    return
  }
  func.func @transform_0(%arg0: i32) -> (i32, i32) {
    %c0_i32 = arith.constant 0 : i32
    %c0_i32_0 = arith.constant 0 : i32
    return %arg0, %c0_i32 : i32, i32
  }
  func.func @transform_1(%arg0: i32) -> (i32, i32) {
    %c0_i32 = arith.constant 0 : i32
    %c0_i32_0 = arith.constant 0 : i32
    return %arg0, %c0_i32 : i32, i32
  }
  func.func @transform_2(%arg0: i32) -> (i32, i32) {
    %c0_i32 = arith.constant 0 : i32
    %c0_i32_0 = arith.constant 0 : i32
    %c0_i32_1 = arith.constant 0 : i32
    return %c0_i32, %c0_i32_0 : i32, i32
  }
  func.func @transform_3(%arg0: i32) -> (i32, i32) {
    %c0_i32 = arith.constant 0 : i32
    %c0_i32_0 = arith.constant 0 : i32
    %c0_i32_1 = arith.constant 0 : i32
    return %c0_i32, %c0_i32_0 : i32, i32
  }
  func.func @transform_4(%arg0: i32) -> (i32, i32) {
    %c0_i32 = arith.constant 0 : i32
    %c0_i32_0 = arith.constant 0 : i32
    %c0_i32_1 = arith.constant 0 : i32
    return %c0_i32, %c0_i32_0 : i32, i32
  }
  func.func @transform_5(%arg0: i32) -> (i32, i32) {
    %c0_i32 = arith.constant 0 : i32
    %c0_i32_0 = arith.constant 0 : i32
    %c0_i32_1 = arith.constant 0 : i32
    return %c0_i32, %c0_i32_0 : i32, i32
  }
  func.func @transform_6(%arg0: i32) -> (i32, i32) {
    %c0_i32 = arith.constant 0 : i32
    %c0_i32_0 = arith.constant 0 : i32
    %c0_i32_1 = arith.constant 0 : i32
    return %c0_i32, %c0_i32_0 : i32, i32
  }
  func.func @transform_7(%arg0: i32) -> (i32, i32) {
    %c0_i32 = arith.constant 0 : i32
    %c0_i32_0 = arith.constant 0 : i32
    %c0_i32_1 = arith.constant 0 : i32
    return %c0_i32, %c0_i32_0 : i32, i32
  }
  func.func @transform_8(%arg0: i32) -> (i32, i32) {
    %c0_i32 = arith.constant 0 : i32
    %c0_i32_0 = arith.constant 0 : i32
    return %arg0, %c0_i32 : i32, i32
  }
  func.func @transform_9(%arg0: i32) -> (i32, i32) {
    %c0_i32 = arith.constant 0 : i32
    %c0_i32_0 = arith.constant 0 : i32
    return %arg0, %c0_i32 : i32, i32
  }
}

</mosaic_0001>

<bundles_post_ra>
// kernel: tpu_custom_call.1
= control target key start
LH: loop header
LB: loop body
LE: loop exit
PB: predicated region body
PF: predicated region fallthrough
CT: control target
= control target key end

     0   :  { %15 = vsyncpa [#allocation3], 0  ;;  %s1092_s0 = inlined_call_operand.vmem [shape: f32[16,128], index: 0, kind: input, shape index: {}]   ;;  %s1093_s1 = inlined_call_operand.vmem [shape: f32[16,8], index: 1, kind: input, shape index: {}]   ;;  %s1094_s2 = inlined_call_operand.hbm [shape: f32[128,512], index: 2, kind: input, shape index: {}]   ;;  %s1095_s3 = inlined_call_operand.hbm [shape: f32[8,512], index: 3, kind: input, shape index: {}]   ;;  %s1096_s4 = inlined_call_operand.hbm [shape: f32[256,128], index: 4, kind: input, shape index: {}]   ;;  %s1097_s5 = inlined_call_operand.vmem [shape: f32[1,128], index: 5, kind: input, shape index: {}]   ;;  %s1098_s6 = inlined_call_operand.hbm [shape: f32[256,128], index: 6, kind: input, shape index: {}]   ;;  %s1099_s7 = inlined_call_operand.vmem [shape: f32[1,128], index: 7, kind: input, shape index: {}]   ;;  %s1100_s8 = inlined_call_operand.hbm [shape: f32[16,128], index: 8, kind: output, shape index: {0}]   ;;  %s1101_s9 = inlined_call_operand.hbm [shape: f32[16,128], index: 9, kind: output, shape index: {1}]  }
   0x1   :  { %16 = vsyncpa [#allocation6], 0 }
   0x2   :  { %17 = vsyncpa [#allocation9], 0 }
   0x3   :  { %18 = vsyncpa [#allocation4], 0 }
   0x4   :  { %19 = vsyncpa [#allocation12], 0  ;;  %s971_s30 = smov [#allocation5]   ;;  %s972_s11 = smov [#allocation2]  }
   0x5   :  { %s42_s10 = sshll.u32 %s971_s30, 4  ;;  %s29_s12 = sshll.u32 %s972_s11, 4  ;;  %s43_s10 = int_to_ptr.vmem [resolvable:$true] %s42_s10  ;;  %s30_s12 = int_to_ptr.vmem [resolvable:$true] %s29_s12 }
   0x6   :  { %s849_s13 = scalar_lea.vmem %s43_s10, 512  ;;  %p854_p1 = scmp.lt.s32.totalorder %s43_s10, %s43_s10 }
   0x7   :  { %p850_p0 = scmp.ne.s32.totalorder %s43_s10, %s849_s13  ;;  %p855_p2 = scmp.lt.s32.totalorder %s849_s13, %s849_s13 }
   0x9   :  { %p856_p3 = por %p855_p2, %p854_p1 }
   0xb   :  { %p857_p4 = pnand %p856_p3, %p850_p0 }
   0xd   :  { %860 = shalt.err (!%p857_p4)
}
   0xe   :  { %45 = dma.hbm_to_vmem [thread:$0]  %s1095_s3, 512, %s43_s10, [#allocation6]  }
   0xf   :  { %s869_s16 = scalar_lea.vmem %s30_s12, 8192  ;;  %p874_p6 = scmp.lt.s32.totalorder %s30_s12, %s30_s12 }
  0x10   :  { %p870_p5 = scmp.ne.s32.totalorder %s30_s12, %s869_s16  ;;  %p875_p7 = scmp.lt.s32.totalorder %s869_s16, %s869_s16 }
  0x12   :  { %p876_p8 = por %p875_p7, %p874_p6 }
  0x14   :  { %p877_p9 = pnand %p876_p8, %p870_p5 }
  0x16   :  { %880 = shalt.err (!%p877_p9)
}
  0x17   :  { %s973_s17 = smov 512   ;;  %s974_s18 = smov 32  }
  0x18   :  { %35 = dma.hbm_to_vmem [thread:$0]  %s1094_s2, 8192, %s30_s12, [#allocation3], %s973_s17, %s973_s17, %s974_s18  }
  0x19   :  { %s975_s21 = smov [#allocation7]  }
  0x1a   :  { %s51_s22 = sshll.u32 %s975_s21, 4  ;;  %s52_s22 = int_to_ptr.vmem [resolvable:$true] %s51_s22 }
  0x1b   :  { %s889_s23 = scalar_lea.vmem %s52_s22, 4096  ;;  %p894_p11 = scmp.lt.s32.totalorder %s52_s22, %s52_s22 }
  0x1c   :  { %p890_p10 = scmp.ne.s32.totalorder %s52_s22, %s889_s23  ;;  %p895_p12 = scmp.lt.s32.totalorder %s889_s23, %s889_s23 }
  0x1e   :  { %p896_p13 = por %p895_p12, %p894_p11 }
  0x20   :  { %p897_p0 = pnand %p896_p13, %p890_p10 }
  0x22   :  { %900 = shalt.err (!%p897_p0)
}
  0x23   :  { %s976_s3 = smov 128   ;;  %s977_s24 = smov 8  }
  0x24   :  { %57 = dma.hbm_to_vmem [thread:$0]  %s1096_s4, 4096, %s52_s22, [#allocation6], %s976_s3, %s976_s3, %s977_s24  }
  0x25   :  { %s978_s2 = smov [#allocation8]  }
  0x26   :  { %s65_s27 = sshll.u32 %s978_s2, 4  ;;  %s66_s27 = int_to_ptr.vmem [resolvable:$true] %s65_s27 }
  0x27   :  { %s909_s28 = scalar_lea.vmem %s66_s27, 4096  ;;  %p914_p2 = scmp.lt.s32.totalorder %s66_s27, %s66_s27 }
  0x28   :  { %p910_p1 = scmp.ne.s32.totalorder %s66_s27, %s909_s28  ;;  %p915_p3 = scmp.lt.s32.totalorder %s909_s28, %s909_s28 }
  0x2a   :  { %p916_p4 = por %p915_p3, %p914_p2 }
  0x2c   :  { %p917_p5 = pnand %p916_p4, %p910_p1 }
  0x2e   :  { %920 = shalt.err (!%p917_p5)
}
  0x2f   :  { %71 = dma.hbm_to_vmem [thread:$0]  %s1098_s6, 4096, %s66_s27, [#allocation9], %s976_s3, %s976_s3, %s977_s24  }
  0x30   :  { %961 = dma.done.wait [#allocation3], 8192  }
  0x31   :  { %962 = vsyncadd [#allocation3], 4294959104 }
  0x32   :  { %963 = dma.done.wait [#allocation6], 4608  }
  0x33   :  { %964 = vsyncadd [#allocation6], 4294962688 }
  0x34   :  { %965 = dma.done.wait [#allocation9], 4096  }
  0x35   :  { %966 = vsyncadd [#allocation9], 4294963200  ;;  %v979_v0 = vmov 0.0   ;;  %v155_v1 = vld [vmem:[#allocation5 + $0x8] sm:$0xff]  ;;  %v157_v2 = vld [vmem:[#allocation5 + $0x18] sm:$0xff]  ;;  %vm158_vm0 = vcmask 64512  }
  0x36   :  { %229 = vmatprep.mubr.f32.mxu0 %v979_v0  ;;  %306 = vmatprep.mubr.f32.mxu1 %v979_v0  ;;  %v154_v3 = vld [vmem:[#allocation5] sm:$0xff]  ;;  %v156_v4 = vld [vmem:[#allocation5 + $0x10] sm:$0xff]  ;;  %v149_v6 = vld [vmem:[#allocation2 + $0x1e8] sm:$0xff]  ;;  %s980_s18 = smov [#allocation10]  }
  0x37   :  { %195 = vmatprep.subr.mxu0 %v155_v1  ;;  %272 = vmatprep.subr.mxu1 %v157_v2  ;;  %v152_v5 = vld [vmem:[%s1093_s1] sm:$0xff]  ;;  %v151_v7 = vld [vmem:[#allocation2 + $0x1f8] sm:$0xff]  ;;  %v150_v9 = vld [vmem:[#allocation2 + $0x1f0] sm:$0xff]  ;;  %s718_s19 = sshll.u32 %s980_s18, 4  ;;  %s719_s19 = int_to_ptr.vmem [resolvable:$true] %s718_s19 }
  0x38   :  { %196 = vmatpush1.msra.mxu0 %v154_v3  ;;  %273 = vmatpush1.msra.mxu1 %v156_v4  ;;  %v148_v8 = vld [vmem:[#allocation2 + $0x1e0] sm:$0xff]  ;;  %v145_v10 = vld [vmem:[#allocation2 + $0x1c8] sm:$0xff]  ;;  %v147_v11 = vld [vmem:[#allocation2 + $0x1d8] sm:$0xff]  ;;  %p926_p7 = scmp.lt.s32.totalorder %s719_s19, %s719_s19 }
  0x39   :  { %748 = vmatmul.mubr.msk.f32.vlgmr.msra.gmra.mxu0 %vm158_vm0, %v152_v5  ;;  %750 = vmatmul.mubr.msk.f32.vlgmr.msra.gmra.mxu1 %vm158_vm0, %v152_v5  ;;  %v144_v12 = vld [vmem:[#allocation2 + $0x1c0] sm:$0xff]  ;;  %v146_v13 = vld [vmem:[#allocation2 + $0x1d0] sm:$0xff]  ;;  %v141_v14 = vld [vmem:[#allocation2 + $0x1a8] sm:$0xff] }
  0x3a   :  { %319 = vmatprep.subr.mxu0 %v149_v6  ;;  %396 = vmatprep.subr.mxu1 %v151_v7  ;;  %v143_v15 = vld [vmem:[#allocation2 + $0x1b8] sm:$0xff]  ;;  %v140_v16 = vld [vmem:[#allocation2 + $0x1a0] sm:$0xff]  ;;  %v142_v17 = vld [vmem:[#allocation2 + $0x1b0] sm:$0xff] }
  0x3b   :  { %320 = vmatpush1.msra.mxu0 %v148_v8  ;;  %397 = vmatpush1.msra.mxu1 %v150_v9  ;;  %v137_v18 = vld [vmem:[#allocation2 + $0x188] sm:$0xff]  ;;  %v139_v19 = vld [vmem:[#allocation2 + $0x198] sm:$0xff]  ;;  %v136_v20 = vld [vmem:[#allocation2 + $0x180] sm:$0xff] }
  0x3c   :  { %321 = vmatprep.subr.mxu0 %v145_v10  ;;  %398 = vmatprep.subr.mxu1 %v147_v11  ;;  %v138_v21 = vld [vmem:[#allocation2 + $0x190] sm:$0xff]  ;;  %v133_v22 = vld [vmem:[#allocation2 + $0x168] sm:$0xff]  ;;  %v135_v23 = vld [vmem:[#allocation2 + $0x178] sm:$0xff] }
  0x3d   :  { %322 = vmatpush1.msra.mxu0 %v144_v12  ;;  %399 = vmatpush1.msra.mxu1 %v146_v13  ;;  %v132_v24 = vld [vmem:[#allocation2 + $0x160] sm:$0xff]  ;;  %v134_v25 = vld [vmem:[#allocation2 + $0x170] sm:$0xff]  ;;  %v129_v26 = vld [vmem:[#allocation2 + $0x148] sm:$0xff] }
  0x3e   :  { %323 = vmatprep.subr.mxu0 %v141_v14  ;;  %400 = vmatprep.subr.mxu1 %v143_v15  ;;  %v131_v27 = vld [vmem:[#allocation2 + $0x158] sm:$0xff]  ;;  %v128_v28 = vld [vmem:[#allocation2 + $0x140] sm:$0xff]  ;;  %v130_v29 = vld [vmem:[#allocation2 + $0x150] sm:$0xff] }
  0x3f   :  { %324 = vmatpush1.msra.mxu0 %v140_v16  ;;  %401 = vmatpush1.msra.mxu1 %v142_v17  ;;  %v125_v30 = vld [vmem:[#allocation2 + $0x128] sm:$0xff]  ;;  %v127_v31 = vld [vmem:[#allocation2 + $0x138] sm:$0xff]  ;;  %v124_v32 = vld [vmem:[#allocation2 + $0x120] sm:$0xff] }
  0x40   :  { %325 = vmatprep.subr.mxu0 %v137_v18  ;;  %402 = vmatprep.subr.mxu1 %v139_v19  ;;  %v126_v33 = vld [vmem:[#allocation2 + $0x130] sm:$0xff]  ;;  %v121_v34 = vld [vmem:[#allocation2 + $0x108] sm:$0xff]  ;;  %v123_v35 = vld [vmem:[#allocation2 + $0x118] sm:$0xff] }
  0x41   :  { %326 = vmatpush1.msra.mxu0 %v136_v20  ;;  %403 = vmatpush1.msra.mxu1 %v138_v21  ;;  %v120_v36 = vld [vmem:[#allocation2 + $0x100] sm:$0xff]  ;;  %v122_v37 = vld [vmem:[#allocation2 + $0x110] sm:$0xff]  ;;  %v117_v38 = vld [vmem:[#allocation2 + $0xe8] sm:$0xff] }
  0x42   :  { %327 = vmatprep.subr.mxu0 %v133_v22  ;;  %404 = vmatprep.subr.mxu1 %v135_v23  ;;  %v119_v39 = vld [vmem:[#allocation2 + $0xf8] sm:$0xff]  ;;  %v116_v40 = vld [vmem:[#allocation2 + $0xe0] sm:$0xff]  ;;  %v118_v41 = vld [vmem:[#allocation2 + $0xf0] sm:$0xff] }
  0x43   :  { %328 = vmatpush1.msra.mxu0 %v132_v24  ;;  %405 = vmatpush1.msra.mxu1 %v134_v25  ;;  %v113_v42 = vld [vmem:[#allocation2 + $0xc8] sm:$0xff]  ;;  %v115_v43 = vld [vmem:[#allocation2 + $0xd8] sm:$0xff]  ;;  %v112_v44 = vld [vmem:[#allocation2 + $0xc0] sm:$0xff] }
  0x44   :  { %329 = vmatprep.subr.mxu0 %v129_v26  ;;  %406 = vmatprep.subr.mxu1 %v131_v27  ;;  %v114_v45 = vld [vmem:[#allocation2 + $0xd0] sm:$0xff]  ;;  %v109_v46 = vld [vmem:[#allocation2 + $0xa8] sm:$0xff]  ;;  %v111_v47 = vld [vmem:[#allocation2 + $0xb8] sm:$0xff] }
  0x45   :  { %330 = vmatpush1.msra.mxu0 %v128_v28  ;;  %407 = vmatpush1.msra.mxu1 %v130_v29  ;;  %v108_v48 = vld [vmem:[#allocation2 + $0xa0] sm:$0xff]  ;;  %v110_v49 = vld [vmem:[#allocation2 + $0xb0] sm:$0xff]  ;;  %v105_v50 = vld [vmem:[#allocation2 + $0x88] sm:$0xff] }
  0x46   :  { %331 = vmatprep.subr.mxu0 %v125_v30  ;;  %408 = vmatprep.subr.mxu1 %v127_v31  ;;  %v107_v51 = vld [vmem:[#allocation2 + $0x98] sm:$0xff]  ;;  %v104_v52 = vld [vmem:[#allocation2 + $0x80] sm:$0xff]  ;;  %v106_v53 = vld [vmem:[#allocation2 + $0x90] sm:$0xff] }
  0x47   :  { %332 = vmatpush1.msra.mxu0 %v124_v32  ;;  %409 = vmatpush1.msra.mxu1 %v126_v33  ;;  %v101_v54 = vld [vmem:[#allocation2 + $0x68] sm:$0xff]  ;;  %v103_v55 = vld [vmem:[#allocation2 + $0x78] sm:$0xff]  ;;  %v100_v56 = vld [vmem:[#allocation2 + $0x60] sm:$0xff] }
  0x48   :  { %333 = vmatprep.subr.mxu0 %v121_v34  ;;  %410 = vmatprep.subr.mxu1 %v123_v35  ;;  %v102_v57 = vld [vmem:[#allocation2 + $0x70] sm:$0xff]  ;;  %v153_v58 = vld [vmem:[%s1093_s1 + $0x8] sm:$0xff]  ;;  %v99_v60 = vld [vmem:[#allocation2 + $0x58] sm:$0xff] }
  0x49   :  { %334 = vmatpush1.msra.mxu0 %v120_v36  ;;  %411 = vmatpush1.msra.mxu1 %v122_v37  ;;  %v97_v59 = vld [vmem:[#allocation2 + $0x48] sm:$0xff]  ;;  %v96_v61 = vld [vmem:[#allocation2 + $0x40] sm:$0xff]  ;;  %v98_v62 = vld [vmem:[#allocation2 + $0x50] sm:$0xff] }
  0x4a   :  { %335 = vmatprep.subr.mxu0 %v117_v38  ;;  %412 = vmatprep.subr.mxu1 %v119_v39  ;;  %v93_v63 = vld [vmem:[#allocation2 + $0x28] sm:$0xff]  ;;  %v95_v1 = vld [vmem:[#allocation2 + $0x38] sm:$0xff]  ;;  %v92_v2 = vld [vmem:[#allocation2 + $0x20] sm:$0xff] }
  0x4b   :  { %336 = vmatpush1.msra.mxu0 %v116_v40  ;;  %413 = vmatpush1.msra.mxu1 %v118_v41  ;;  %v94_v3 = vld [vmem:[#allocation2 + $0x30] sm:$0xff]  ;;  %v89_v4 = vld [vmem:[#allocation2 + $0x8] sm:$0xff]  ;;  %v91_v5 = vld [vmem:[#allocation2 + $0x18] sm:$0xff] }
  0x4c   :  { %337 = vmatprep.subr.mxu0 %v113_v42  ;;  %414 = vmatprep.subr.mxu1 %v115_v43  ;;  %v88_v6 = vld [vmem:[#allocation2] sm:$0xff]  ;;  %v90_v7 = vld [vmem:[#allocation2 + $0x10] sm:$0xff]  ;;  %v87_v9 = vld [vmem:[%s1092_s0 + $0x8] sm:$0xff] }
  0x4d   :  { %338 = vmatpush1.msra.mxu0 %v112_v44  ;;  %415 = vmatpush1.msra.mxu1 %v114_v45  ;;  %v86_v8 = vld [vmem:[%s1092_s0] sm:$0xff]  ;;  %v512_v10 = vld [vmem:[#allocation7 + $0xf8] sm:$0xff]  ;;  %v511_v14 = vld [vmem:[#allocation7 + $0xf0] sm:$0xff] }
  0x4e   :  { %339 = vmatprep.subr.mxu0 %v109_v46  ;;  %416 = vmatprep.subr.mxu1 %v111_v47  ;;  %v628_v11 = vld [vmem:[#allocation8 + $0xf8] sm:$0xff]  ;;  %v627_v15 = vld [vmem:[#allocation8 + $0xf0] sm:$0xff]  ;;  %v510_v18 = vld [vmem:[#allocation7 + $0xe8] sm:$0xff] }
  0x4f   :  { %340 = vmatpush1.msra.mxu0 %v108_v48  ;;  %417 = vmatpush1.msra.mxu1 %v110_v49  ;;  %v496_v12 = vld [vmem:[#allocation7 + $0x78] sm:$0xff]  ;;  %v495_v16 = vld [vmem:[#allocation7 + $0x70] sm:$0xff]  ;;  %v494_v19 = vld [vmem:[#allocation7 + $0x68] sm:$0xff] }
  0x50   :  { %341 = vmatprep.subr.mxu0 %v105_v50  ;;  %418 = vmatprep.subr.mxu1 %v107_v51  ;;  %v612_v13 = vld [vmem:[#allocation8 + $0x78] sm:$0xff]  ;;  %v611_v17 = vld [vmem:[#allocation8 + $0x70] sm:$0xff]  ;;  %v610_v20 = vld [vmem:[#allocation8 + $0x68] sm:$0xff] }
  0x51   :  { %342 = vmatpush1.msra.mxu0 %v104_v52  ;;  %419 = vmatpush1.msra.mxu1 %v106_v53  ;;  %v509_v21 = vld [vmem:[#allocation7 + $0xe0] sm:$0xff]  ;;  %v508_v25 = vld [vmem:[#allocation7 + $0xd8] sm:$0xff]  ;;  %v507_v29 = vld [vmem:[#allocation7 + $0xd0] sm:$0xff] }
  0x52   :  { %343 = vmatprep.subr.mxu0 %v101_v54  ;;  %420 = vmatprep.subr.mxu1 %v103_v55  ;;  %v625_v22 = vld [vmem:[#allocation8 + $0xe0] sm:$0xff]  ;;  %v624_v26 = vld [vmem:[#allocation8 + $0xd8] sm:$0xff]  ;;  %v623_v30 = vld [vmem:[#allocation8 + $0xd0] sm:$0xff] }
  0x53   :  { %235 = vmatprep.mubr.f32.mxu0 %v979_v0  ;;  %312 = vmatprep.mubr.f32.mxu1 %v979_v0  ;;  %v493_v23 = vld [vmem:[#allocation7 + $0x60] sm:$0xff]  ;;  %v492_v27 = vld [vmem:[#allocation7 + $0x58] sm:$0xff]  ;;  %v491_v31 = vld [vmem:[#allocation7 + $0x50] sm:$0xff] }
  0x54   :  { %344 = vmatpush1.msra.mxu0 %v100_v56  ;;  %421 = vmatpush1.msra.mxu1 %v102_v57  ;;  %v609_v24 = vld [vmem:[#allocation8 + $0x60] sm:$0xff]  ;;  %v608_v28 = vld [vmem:[#allocation8 + $0x58] sm:$0xff]  ;;  %v607_v32 = vld [vmem:[#allocation8 + $0x50] sm:$0xff] }
  0x55   :  { %749 = vmatmul.mubr.msk.f32.gmra.mxu0 %vm158_vm0, %v153_v58  ;;  %751 = vmatmul.mubr.msk.f32.gmra.mxu1 %vm158_vm0, %v153_v58  ;;  %v506_v33 = vld [vmem:[#allocation7 + $0xc8] sm:$0xff]  ;;  %v505_v37 = vld [vmem:[#allocation7 + $0xc0] sm:$0xff]  ;;  %v504_v41 = vld [vmem:[#allocation7 + $0xb8] sm:$0xff] }
  0x56   :  { %345 = vmatprep.subr.mxu0 %v97_v59  ;;  %422 = vmatprep.subr.mxu1 %v99_v60  ;;  %v622_v34 = vld [vmem:[#allocation8 + $0xc8] sm:$0xff]  ;;  %v621_v38 = vld [vmem:[#allocation8 + $0xc0] sm:$0xff]  ;;  %v620_v42 = vld [vmem:[#allocation8 + $0xb8] sm:$0xff] }
  0x57   :  { %346 = vmatpush1.msra.mxu0 %v96_v61  ;;  %423 = vmatpush1.msra.mxu1 %v98_v62  ;;  %v490_v35 = vld [vmem:[#allocation7 + $0x48] sm:$0xff]  ;;  %v489_v39 = vld [vmem:[#allocation7 + $0x40] sm:$0xff]  ;;  %v488_v43 = vld [vmem:[#allocation7 + $0x38] sm:$0xff] }
  0x58   :  { %347 = vmatprep.subr.mxu0 %v93_v63  ;;  %424 = vmatprep.subr.mxu1 %v95_v1  ;;  %v606_v36 = vld [vmem:[#allocation8 + $0x48] sm:$0xff]  ;;  %v605_v40 = vld [vmem:[#allocation8 + $0x40] sm:$0xff]  ;;  %v604_v44 = vld [vmem:[#allocation8 + $0x38] sm:$0xff] }
  0x59   :  { %348 = vmatpush1.msra.mxu0 %v92_v2  ;;  %425 = vmatpush1.msra.mxu1 %v94_v3  ;;  %v503_v45 = vld [vmem:[#allocation7 + $0xb0] sm:$0xff]  ;;  %v502_v49 = vld [vmem:[#allocation7 + $0xa8] sm:$0xff]  ;;  %v501_v53 = vld [vmem:[#allocation7 + $0xa0] sm:$0xff] }
  0x5a   :  { %349 = vmatprep.subr.mxu0 %v89_v4  ;;  %426 = vmatprep.subr.mxu1 %v91_v5  ;;  %v619_v46 = vld [vmem:[#allocation8 + $0xb0] sm:$0xff]  ;;  %v618_v50 = vld [vmem:[#allocation8 + $0xa8] sm:$0xff]  ;;  %v617_v54 = vld [vmem:[#allocation8 + $0xa0] sm:$0xff] }
  0x5b   :  { %350 = vmatpush1.msra.mxu0 %v88_v6  ;;  %383 = vmatprep.mubr.f32.mxu0 %v979_v0  ;;  %v487_v47 = vld [vmem:[#allocation7 + $0x30] sm:$0xff]  ;;  %v486_v51 = vld [vmem:[#allocation7 + $0x28] sm:$0xff]  ;;  %v485_v55 = vld [vmem:[#allocation7 + $0x20] sm:$0xff] }
  0x5c   :  { %427 = vmatpush1.msra.mxu1 %v90_v7  ;;  %460 = vmatprep.mubr.f32.mxu1 %v979_v0  ;;  %v603_v48 = vld [vmem:[#allocation8 + $0x30] sm:$0xff]  ;;  %v602_v52 = vld [vmem:[#allocation8 + $0x28] sm:$0xff]  ;;  %v601_v56 = vld [vmem:[#allocation8 + $0x20] sm:$0xff] }
  0x5d   :  { %384 = vmatmul.mubr.f32.vlgmr.msra.gmra.mxu0 %v86_v8  ;;  %461 = vmatmul.mubr.f32.vlgmr.msra.gmra.mxu1 %v86_v8  ;;  %v500_v57 = vld [vmem:[#allocation7 + $0x98] sm:$0xff]  ;;  %v499_v61 = vld [vmem:[#allocation7 + $0x90] sm:$0xff]  ;;  %v498_v2 = vld [vmem:[#allocation7 + $0x88] sm:$0xff] }
  0x5e   :  { %389 = vmatprep.mubr.f32.mxu0 %v979_v0  ;;  %466 = vmatprep.mubr.f32.mxu1 %v979_v0  ;;  %v626_v0 = vld [vmem:[#allocation8 + $0xe8] sm:$0xff]  ;;  %v616_v58 = vld [vmem:[#allocation8 + $0x98] sm:$0xff]  ;;  %v615_v62 = vld [vmem:[#allocation8 + $0x90] sm:$0xff] }
  0x5f   :  { %754 = vmatprep.subr.mxu0 %v512_v10  ;;  %792 = vmatprep.subr.mxu1 %v628_v11  ;;  %v484_v59 = vld [vmem:[#allocation7 + $0x18] sm:$0xff]  ;;  %v483_v63 = vld [vmem:[#allocation7 + $0x10] sm:$0xff]  ;;  %v614_v3 = vld [vmem:[#allocation8 + $0x88] sm:$0xff] }
  0x60   :  { %755 = vmatpush3.msra.mxu0 %v496_v12  ;;  %793 = vmatpush3.msra.mxu1 %v612_v13  ;;  %v600_v60 = vld [vmem:[#allocation8 + $0x18] sm:$0xff]  ;;  %v599_v1 = vld [vmem:[#allocation8 + $0x10] sm:$0xff]  ;;  %v482_v4 = vld [vmem:[#allocation7 + $0x8] sm:$0xff] }
  0x61   :  { %390 = vmatmul.mubr.f32.gmra.mxu0 %v87_v9  ;;  %467 = vmatmul.mubr.f32.gmra.mxu1 %v87_v9  ;;  %v598_v5 = vld [vmem:[#allocation8 + $0x8] sm:$0xff]  ;;  %v497_v6 = vld [vmem:[#allocation7 + $0x80] sm:$0xff] }
  0x62   :  { %756 = vmatprep.subr.mxu0 %v511_v14  ;;  %794 = vmatprep.subr.mxu1 %v627_v15  ;;  %v613_v7 = vld [vmem:[#allocation8 + $0x80] sm:$0xff] }
  0x63   :  { %757 = vmatpush3.msra.mxu0 %v495_v16  ;;  %795 = vmatpush3.msra.mxu1 %v611_v17  ;;  %v481_v8 = vld [vmem:[#allocation7] sm:$0xff] }
  0x64   :  { %758 = vmatprep.subr.mxu0 %v510_v18  ;;  %796 = vmatprep.subr.mxu1 %v626_v0  ;;  %v597_v9 = vld [vmem:[#allocation8] sm:$0xff] }
  0x65   :  { %759 = vmatpush3.msra.mxu0 %v494_v19  ;;  %797 = vmatpush3.msra.mxu1 %v610_v20 }
  0x66   :  { %760 = vmatprep.subr.mxu0 %v509_v21  ;;  %798 = vmatprep.subr.mxu1 %v625_v22 }
  0x67   :  { %761 = vmatpush3.msra.mxu0 %v493_v23  ;;  %799 = vmatpush3.msra.mxu1 %v609_v24 }
  0x68   :  { %762 = vmatprep.subr.mxu0 %v508_v25  ;;  %800 = vmatprep.subr.mxu1 %v624_v26 }
  0x69   :  { %763 = vmatpush3.msra.mxu0 %v492_v27  ;;  %801 = vmatpush3.msra.mxu1 %v608_v28 }
  0x6a   :  { %764 = vmatprep.subr.mxu0 %v507_v29  ;;  %802 = vmatprep.subr.mxu1 %v623_v30 }
  0x6b   :  { %765 = vmatpush3.msra.mxu0 %v491_v31  ;;  %803 = vmatpush3.msra.mxu1 %v607_v32 }
  0x6c   :  { %766 = vmatprep.subr.mxu0 %v506_v33  ;;  %804 = vmatprep.subr.mxu1 %v622_v34 }
  0x6d   :  { %767 = vmatpush3.msra.mxu0 %v490_v35  ;;  %805 = vmatpush3.msra.mxu1 %v606_v36 }
  0x6e   :  { %768 = vmatprep.subr.mxu0 %v505_v37  ;;  %806 = vmatprep.subr.mxu1 %v621_v38 }
  0x6f   :  { %769 = vmatpush3.msra.mxu0 %v489_v39  ;;  %807 = vmatpush3.msra.mxu1 %v605_v40 }
  0x70   :  { %770 = vmatprep.subr.mxu0 %v504_v41  ;;  %808 = vmatprep.subr.mxu1 %v620_v42 }
  0x71   :  { %771 = vmatpush3.msra.mxu0 %v488_v43  ;;  %809 = vmatpush3.msra.mxu1 %v604_v44  ;;  %v752_v43 = vld [vmem:[%s1097_s5] ss:$0 sm:$0xff]  ;;  %s981_s5 = smov [#allocation11]  }
  0x72   :  { %772 = vmatprep.subr.mxu0 %v503_v45  ;;  %810 = vmatprep.subr.mxu1 %v619_v46  ;;  %v753_v45 = vld [vmem:[%s1099_s7] ss:$0 sm:$0xff]  ;;  %s730_s20 = sshll.u32 %s981_s5, 4  ;;  %s921_s7 = scalar_lea.vmem %s719_s19, 256  ;;  %s731_s20 = int_to_ptr.vmem [resolvable:$true] %s730_s20 }
  0x73   :  { %773 = vmatpush3.msra.mxu0 %v487_v47  ;;  %811 = vmatpush3.msra.mxu1 %v603_v48  ;;  %p922_p6 = scmp.ne.s32.totalorder %s719_s19, %s921_s7  ;;  %p927_p8 = scmp.lt.s32.totalorder %s921_s7, %s921_s7 }
  0x74   :  { %774 = vmatprep.subr.mxu0 %v502_v49  ;;  %812 = vmatprep.subr.mxu1 %v618_v50 }
  0x75   :  { %775 = vmatpush3.msra.mxu0 %v486_v51  ;;  %813 = vmatpush3.msra.mxu1 %v602_v52  ;;  %p928_p9 = por %p927_p8, %p926_p7 }
  0x76   :  { %776 = vmatprep.subr.mxu0 %v501_v53  ;;  %814 = vmatprep.subr.mxu1 %v617_v54 }
  0x77   :  { %777 = vmatpush3.msra.mxu0 %v485_v55  ;;  %815 = vmatpush3.msra.mxu1 %v601_v56  ;;  %p929_p10 = pnand %p928_p9, %p922_p6 }
  0x78   :  { %778 = vmatprep.subr.mxu0 %v500_v57  ;;  %816 = vmatprep.subr.mxu1 %v616_v58 }
  0x79   :  { %779 = vmatpush3.msra.mxu0 %v484_v59  ;;  %817 = vmatpush3.msra.mxu1 %v600_v60 }
  0x7a   :  { %780 = vmatprep.subr.mxu0 %v499_v61  ;;  %818 = vmatprep.subr.mxu1 %v615_v62 }
  0x7b   :  { %781 = vmatpush3.msra.mxu0 %v483_v63  ;;  %819 = vmatpush3.msra.mxu1 %v599_v1 }
  0x7c   :  { %782 = vmatprep.subr.mxu0 %v498_v2  ;;  %820 = vmatprep.subr.mxu1 %v614_v3 }
  0x7d   :  { %783 = vmatpush3.msra.mxu0 %v482_v4  ;;  %821 = vmatpush3.msra.mxu1 %v598_v5 }
  0x7e   :  { %784 = vmatprep.subr.mxu0 %v497_v6  ;;  %822 = vmatprep.subr.mxu1 %v613_v7 }
  0x7f   :  { %785 = vmatpush3.msra.mxu0 %v481_v8  ;;  %823 = vmatpush3.msra.mxu1 %v597_v9 }
  0xf9   :  { %v231_v10 = vpop.f32.mrf.mxu0  ;;  %v308_v11 = vpop.f32.mrf.mxu1 }
  0xfb   :  { %v233_v12 = vpop.f32.mrf.mxu0  ;;  %v310_v13 = vpop.f32.mrf.mxu1 }
 0x115   :  { %v237_v14 = vpop.f32.mrf.mxu0  ;;  %v314_v15 = vpop.f32.mrf.mxu1 }
 0x117   :  { %v239_v16 = vpop.f32.mrf.mxu0  ;;  %v316_v17 = vpop.f32.mrf.mxu1 }
 0x11d   :  { %v385_v18 = vpop.f32.mrf.mxu0  ;;  %v462_v0 = vpop.f32.mrf.mxu1 }
 0x11e   :  { %v386_v19 = vadd.f32 %v385_v18, %v231_v10  ;;  %v463_v20 = vadd.f32 %v462_v0, %v308_v11 }
 0x11f   :  { %v387_v21 = vpop.f32.mrf.mxu0  ;;  %v464_v22 = vpop.f32.mrf.mxu1 }
 0x120   :  { %v388_v23 = vadd.f32 %v387_v21, %v233_v12  ;;  %v465_v24 = vadd.f32 %v464_v22, %v310_v13  ;;  %v473_v29 = vmax.f32 %v386_v19, 0.0  ;;  %v475_v30 = vmax.f32 %v463_v20, 0.0 }
 0x121   :  { %v391_v25 = vpop.f32.mrf.mxu0  ;;  %v468_v26 = vpop.f32.mrf.mxu1 }
 0x122   :  { %v474_v27 = vmax.f32 %v388_v23, 0.0  ;;  %v476_v28 = vmax.f32 %v465_v24, 0.0  ;;  %v392_v31 = vadd.f32 %v391_v25, %v237_v14  ;;  %v469_v32 = vadd.f32 %v468_v26, %v314_v15 }
 0x123   :  { %v393_v33 = vpop.f32.mrf.mxu0  ;;  %v470_v34 = vpop.f32.mrf.mxu1 }
 0x124   :  { %v394_v35 = vadd.f32 %v393_v33, %v239_v16  ;;  %v471_v36 = vadd.f32 %v470_v34, %v316_v17  ;;  %584 = vmatprep.mubr.f32.mxu0 %v474_v27  ;;  %700 = vmatprep.mubr.f32.mxu1 %v476_v28  ;;  %v477_v39 = vmax.f32 %v392_v31, 0.0  ;;  %v479_v40 = vmax.f32 %v469_v32, 0.0 }
 0x125   :  { %585 = vmatmul.mubr.f32.vlgmr.msra.gmra.mxu0 %v473_v29  ;;  %701 = vmatmul.mubr.f32.vlgmr.msra.gmra.mxu1 %v475_v30 }
 0x126   :  { %v478_v37 = vmax.f32 %v394_v35, 0.0  ;;  %v480_v38 = vmax.f32 %v471_v36, 0.0 }
 0x128   :  { %589 = vmatprep.mubr.f32.mxu0 %v478_v37  ;;  %705 = vmatprep.mubr.f32.mxu1 %v480_v38 }
 0x129   :  { %590 = vmatmul.mubr.f32.gmra.mxu0 %v477_v39  ;;  %706 = vmatmul.mubr.f32.gmra.mxu1 %v479_v40 }
 0x1e5   :  { %v786_v41 = vpop.f32.mrf.mxu0  ;;  %v824_v42 = vpop.f32.mrf.mxu1 }
 0x1e7   :  { %v787_v44 = vpop.f32.mrf.mxu0  ;;  %v825_v46 = vpop.f32.mrf.mxu1 }
 0x1e8   :  { %v788_v47 = vadd.f32 %v787_v44, %v786_v41  ;;  %v826_v48 = vadd.f32 %v825_v46, %v824_v42 }
 0x1e9   :  { %v789_v49 = vpop.f32.mrf.mxu0  ;;  %v827_v50 = vpop.f32.mrf.mxu1 }
 0x1ea   :  { %v587_v51 = vadd.f32 %v788_v47, %v752_v43  ;;  %v703_v52 = vadd.f32 %v826_v48, %v753_v45 }
 0x1eb   :  { %v790_v53 = vpop.f32.mrf.mxu0  ;;  %v828_v54 = vpop.f32.mrf.mxu1 }
 0x1ec   :  { %595 = vst [vmem:[#allocation10] sm:$0xff] %v587_v51  ;;  %711 = vst [vmem:[#allocation11] sm:$0xff] %v703_v52  ;;  %v791_v55 = vadd.f32 %v790_v53, %v789_v49  ;;  %v829_v56 = vadd.f32 %v828_v54, %v827_v50 }
 0x1ee   :  { %v592_v57 = vadd.f32 %v791_v55, %v752_v43  ;;  %v708_v58 = vadd.f32 %v829_v56, %v753_v45 }
 0x1f0   :  { %596 = vst [vmem:[#allocation10 + $0x8] sm:$0xff] %v592_v57  ;;  %712 = vst [vmem:[#allocation11 + $0x8] sm:$0xff] %v708_v58 }
 0x1f1   :  { %932 = shalt.err (!%p929_p10)
}
 0x1f2   :  { %724 = dma.vmem_to_hbm [thread:$0]  %s719_s19, 256, %s1100_s8, [#allocation4], %s976_s3, %s976_s3, %s977_s24  }
 0x1f3   :  { %s941_s23 = scalar_lea.vmem %s731_s20, 256  ;;  %p946_p12 = scmp.lt.s32.totalorder %s731_s20, %s731_s20 }
 0x1f4   :  { %p942_p11 = scmp.ne.s32.totalorder %s731_s20, %s941_s23  ;;  %p947_p13 = scmp.lt.s32.totalorder %s941_s23, %s941_s23 }
 0x1f6   :  { %p948_p0 = por %p947_p13, %p946_p12 }
 0x1f8   :  { %p949_p1 = pnand %p948_p0, %p942_p11 }
 0x1fa   :  { %952 = shalt.err (!%p949_p1)
}
 0x1fb   :  { %736 = dma.vmem_to_hbm [thread:$0]  %s731_s20, 256, %s1101_s9, [#allocation12], %s976_s3, %s976_s3, %s977_s24  }
 0x1fc   :  { %967 = dma.done.wait [#allocation4], 256  }
 0x1fd   :  { %968 = vsyncadd [#allocation4], 4294967040 }
 0x1fe   :  { %969 = dma.done.wait [#allocation12], 256  }
 0x1ff   :  { %970 = vsyncadd [#allocation12], 4294967040 }
 0x200   :  { %743 = vsyncpa [#allocation3], 1 }
 0x201   :  { %744 = vsyncpa [#allocation6], 1 }
 0x202   :  { %745 = vsyncpa [#allocation9], 1 }
 0x203   :  { %746 = vsyncpa [#allocation4], 1 }
 0x204   :  { %747 = vsyncpa [#allocation12], 1 }

</bundles_post_ra>
